<compile_context>
chip_gen: v6e
topology: v6e:2x2x1
jax: 0.10.0
libtpu: 0.0.40
codegen_flags: <defaults>
</compile_context>

<pallas_src>
import numpy as np
import jax
import jax.numpy as jnp
from jax import lax
from jax.experimental import pallas as pl
from jax.experimental.pallas import tpu as pltpu


def resblock_kernel(x_ref, w1_ref, w2_ref, o_ref):
    # x_ref : (Nb, H, W*C) f32   activations; W and C folded into the lane axis
    # w*_ref: (W*C, 3*W*C)       dy-fused banded weights (bf16 on TPU, f32 fallback)
    # o_ref : (Nb, H, W*C) f32
    Nb, H, WC = x_ref.shape
    mm_dtype = w1_ref.dtype                        # bf16 MXU operands on every TPU gen

    def conv3x3(imgs, w_ref):
        # imgs: list of Nb (H, WC) f32 arrays.
        # H-direction reflect pad from values (row -1 -> row 1, row H -> row H-2),
        # stacking all Nb images into one tall LHS so a single MXU push does the conv.
        pieces = []
        for xi in imgs:
            pieces += [xi[1:2], xi, xi[H - 2:H - 1]]
        padded = jnp.concatenate(pieces, axis=0).astype(mm_dtype)   # (Nb*(H+2), WC)
        # One matmul for all dy taps and all Nb images: M=Nb*(H+2), K=WC, N=3*WC.
        r = jnp.dot(padded, w_ref[...], preferred_element_type=jnp.float32)
        outs = []
        for i in range(Nb):                       # static unroll, Nb is small
            b = i * (H + 2)
            outs.append(r[b:b + H, 0:WC]
                        + r[b + 1:b + 1 + H, WC:2 * WC]
                        + r[b + 2:b + 2 + H, 2 * WC:3 * WC])
        return outs                               # Nb x (H, WC) f32

    xs = [x_ref[i] for i in range(Nb)]            # f32; also the residual (read once)
    y1 = [jnp.maximum(y, 0.0) for y in conv3x3(xs, w1_ref)]   # ReLU in f32 on the VPU
    y2 = conv3x3(y1, w2_ref)
    for i in range(Nb):
        o_ref[i] = (y2[i] + xs[i]).astype(o_ref.dtype)        # f32 residual, lane-dense store


def pack_banded_weights(w_hwio, width, dtype):
    """Fold (3, 3, Cin, Cout) conv weights + W-direction reflect padding into a single
    dy-fused (W*Cin, 3*W*Cout) matrix.  Column block dy holds the banded weight for
    kernel row dy with the dx shift, Cin->Cout mixing and W-reflection baked in."""
    kh, kw, cin, cout = w_hwio.shape
    assert (kh, kw) == (3, 3) and cin == cout
    w_np = np.asarray(w_hwio, np.float32)

    def refl(j):  # reflect an out-of-range column index back into [0, width)
        if j < 0:
            return -j
        if j >= width:
            return 2 * width - 2 - j
        return j

    wc_in, wc_out = width * cin, width * cout
    fused = np.zeros((wc_in, 3 * wc_out), np.float32)
    for dy in range(3):
        col0 = dy * wc_out
        for w in range(width):
            for dx in range(3):
                src = refl(w + dx - 1)
                fused[src * cin:(src + 1) * cin,
                      col0 + w * cout: col0 + (w + 1) * cout] += w_np[dy, dx]
    return jnp.asarray(fused, dtype)


def resblock_pallas(x_nhwc, wf1, wf2, *, images_per_step=1):
    """x_nhwc: (N, H, W, C) f32; wf*: (W*C, 3*W*C) dy-fused banded weights."""
    N, H, W, C = x_nhwc.shape
    WC = W * C
    assert H >= 2 and W >= 2, "reflect padding (pad=1) requires H >= 2 and W >= 2"
    assert WC % 128 == 0, "lane-dense design assumes W*C is a multiple of 128"
    Nb = images_per_step
    assert N % Nb == 0
    x2d = x_nhwc.reshape(N, H, WC)      # free row-major reshape; last dim lane-dense

    out = pl.pallas_call(
        resblock_kernel,
        out_shape=jax.ShapeDtypeStruct((N, H, WC), jnp.float32),
        grid=(N // Nb,),
        in_specs=[
            pl.BlockSpec((Nb, H, WC), lambda b: (b, 0, 0)),
            # Constant index_map -> weights stay VMEM-resident across grid steps.
            pl.BlockSpec((WC, 3 * WC), lambda b: (0, 0)),
            pl.BlockSpec((WC, 3 * WC), lambda b: (0, 0)),
        ],
        out_specs=pl.BlockSpec((Nb, H, WC), lambda b: (b, 0, 0)),
        compiler_params=pltpu.CompilerParams(
            # "parallel": with >=2 grid steps v7x shards images across its 2 TCs;
            # neutral on single-TC v5e/v6e.
            dimension_semantics=("parallel",),
        ),
    )(x2d, wf1, wf2)
    return out.reshape(N, H, W, C)


def resblock_reference(x_nhwc, w1_hwio, w2_hwio):
    """Pure-JAX f32 reference using lax.conv with explicit reflect padding."""
    dn = ("NHWC", "HWIO", "NHWC")
    xp = jnp.pad(x_nhwc, ((0, 0), (1, 1), (1, 1), (0, 0)), mode="reflect")
    y1 = lax.conv_general_dilated(xp, w1_hwio, (1, 1), "VALID", dimension_numbers=dn)
    y1 = jnp.maximum(y1, 0.0)
    y1p = jnp.pad(y1, ((0, 0), (1, 1), (1, 1), (0, 0)), mode="reflect")
    y2 = lax.conv_general_dilated(y1p, w2_hwio, (1, 1), "VALID", dimension_numbers=dn)
    return y2 + x_nhwc


if __name__ == "__main__":
    # in_channel == out_channel; W*C = 128 = lane width.  N=4 with Nb=2 images per grid
    # step -> grid=(2,): M = Nb*(H+2) = 36 per matmul and both v7x TCs get work.
    N, C, H, W = 4, 8, 16, 16
    Nb = 2

    # bf16 MXU operands (f32 accumulation) on every TPU generation, incl. v5e.
    use_bf16 = jax.devices()[0].platform == "tpu"
    mm_dtype = jnp.bfloat16 if use_bf16 else jnp.float32

    key = jax.random.PRNGKey(0)
    kx, kw1, kw2 = jax.random.split(key, 3)

    # Input in PyTorch NCHW convention, then transposed to NHWC for the TPU kernel.
    x_nchw = jax.random.normal(kx, (N, C, H, W), dtype=jnp.float32)
    x_nhwc = jnp.transpose(x_nchw, (0, 2, 3, 1))

    # Deterministic conv weights, PyTorch layout (Cout, Cin, kh, kw), no bias / no norm.
    bound = 1.0 / (C * 9) ** 0.5
    w1_oihw = jax.random.uniform(kw1, (C, C, 3, 3), jnp.float32, -bound, bound)
    w2_oihw = jax.random.uniform(kw2, (C, C, 3, 3), jnp.float32, -bound, bound)
    w1_hwio = jnp.transpose(w1_oihw, (2, 3, 1, 0))
    w2_hwio = jnp.transpose(w2_oihw, (2, 3, 1, 0))

    # dy-fused banded weights: dx shift + channel mixing + W-reflection baked in.
    wf1 = pack_banded_weights(w1_hwio, W, mm_dtype)
    wf2 = pack_banded_weights(w2_hwio, W, mm_dtype)

    out = resblock_pallas(x_nhwc, wf1, wf2, images_per_step=Nb)
    out = jax.block_until_ready(out)

    ref = resblock_reference(x_nhwc, w1_hwio, w2_hwio)
    tol = 5e-2 if use_bf16 else 5e-4
    err = float(jnp.max(jnp.abs(out - ref)))
    assert out.shape == (N, H, W, C)
    assert jnp.allclose(out, ref, atol=tol, rtol=tol), err

    print("KERNEL_OK")
</pallas_src>

<mosaic_0001>
module attributes {stable_mosaic.version = 11 : i64} {
  func.func @resblock_kernel(%arg0: i32, %arg1: memref<2x16x128xf32, #tpu.memory_space<vmem>>, %arg2: memref<128x384xf32, #tpu.memory_space<vmem>>, %arg3: memref<128x384xf32, #tpu.memory_space<vmem>>, %arg4: memref<2x16x128xf32, #tpu.memory_space<vmem>>) attributes {dimension_semantics = [#tpu.dimension_semantics<parallel>], iteration_bounds = array<i64: 2>, scalar_prefetch = 0 : i64, scratch_operands = 0 : i64, tpu.core_type = #tpu.core_type<tc>, window_params = [{transform_indices = @transform_0, window_bounds = array<i64: 2, 16, 128>}, {pipeline_mode = #tpu.pipeline_mode<synchronous>, transform_indices = @transform_1, window_bounds = array<i64: 128, 384>}, {pipeline_mode = #tpu.pipeline_mode<synchronous>, transform_indices = @transform_2, window_bounds = array<i64: 128, 384>}, {transform_indices = @transform_3, window_bounds = array<i64: 2, 16, 128>}]} {
    %c0 = arith.constant 0 : index
    %c0_0 = arith.constant 0 : index
    %c0_1 = arith.constant 0 : index
    %0 = vector.load %arg1[%c0, %c0_0, %c0_1] : memref<2x16x128xf32, #tpu.memory_space<vmem>>, vector<1x16x128xf32>
    %1 = vector.shape_cast %0 : vector<1x16x128xf32> to vector<16x128xf32>
    %c1 = arith.constant 1 : index
    %c0_2 = arith.constant 0 : index
    %c0_3 = arith.constant 0 : index
    %2 = vector.load %arg1[%c1, %c0_2, %c0_3] : memref<2x16x128xf32, #tpu.memory_space<vmem>>, vector<1x16x128xf32>
    %3 = vector.shape_cast %2 : vector<1x16x128xf32> to vector<16x128xf32>
    %4 = vector.extract_strided_slice %1 {offsets = [1, 0], sizes = [1, 128], strides = [1, 1]} : vector<16x128xf32> to vector<1x128xf32>
    %5 = vector.extract_strided_slice %1 {offsets = [14, 0], sizes = [1, 128], strides = [1, 1]} : vector<16x128xf32> to vector<1x128xf32>
    %6 = vector.extract_strided_slice %3 {offsets = [1, 0], sizes = [1, 128], strides = [1, 1]} : vector<16x128xf32> to vector<1x128xf32>
    %7 = vector.extract_strided_slice %3 {offsets = [14, 0], sizes = [1, 128], strides = [1, 1]} : vector<16x128xf32> to vector<1x128xf32>
    %8 = tpu.concatenate %4, %1, %5, %6, %3, %7 in 0 : vector<1x128xf32>, vector<16x128xf32>, vector<1x128xf32>, vector<1x128xf32>, vector<16x128xf32>, vector<1x128xf32> -> vector<36x128xf32>
    %c0_4 = arith.constant 0 : index
    %c0_5 = arith.constant 0 : index
    %9 = vector.load %arg2[%c0_4, %c0_5] : memref<128x384xf32, #tpu.memory_space<vmem>>, vector<128x384xf32>
    %cst = arith.constant dense<0.000000e+00> : vector<36x384xf32>
    %10 = tpu.matmul %8, %9, %cst {dimension_numbers = #tpu.dot_dimension_numbers<[1], [0], [0], [1], [0, 0, 1, 1], [], []>} : vector<36x128xf32>, vector<128x384xf32>, vector<36x384xf32> -> vector<36x384xf32>
    %11 = vector.extract_strided_slice %10 {offsets = [0, 0], sizes = [16, 128], strides = [1, 1]} : vector<36x384xf32> to vector<16x128xf32>
    %12 = vector.extract_strided_slice %10 {offsets = [1, 128], sizes = [16, 128], strides = [1, 1]} : vector<36x384xf32> to vector<16x128xf32>
    %13 = arith.addf %11, %12 : vector<16x128xf32>
    %14 = vector.extract_strided_slice %10 {offsets = [2, 256], sizes = [16, 128], strides = [1, 1]} : vector<36x384xf32> to vector<16x128xf32>
    %15 = arith.addf %13, %14 : vector<16x128xf32>
    %16 = vector.extract_strided_slice %10 {offsets = [18, 0], sizes = [16, 128], strides = [1, 1]} : vector<36x384xf32> to vector<16x128xf32>
    %17 = vector.extract_strided_slice %10 {offsets = [19, 128], sizes = [16, 128], strides = [1, 1]} : vector<36x384xf32> to vector<16x128xf32>
    %18 = arith.addf %16, %17 : vector<16x128xf32>
    %19 = vector.extract_strided_slice %10 {offsets = [20, 256], sizes = [16, 128], strides = [1, 1]} : vector<36x384xf32> to vector<16x128xf32>
    %20 = arith.addf %18, %19 : vector<16x128xf32>
    %cst_6 = arith.constant 0.000000e+00 : f32
    %21 = vector.broadcast %cst_6 : f32 to vector<16x128xf32>
    %22 = arith.maximumf %15, %21 : vector<16x128xf32>
    %cst_7 = arith.constant 0.000000e+00 : f32
    %23 = vector.broadcast %cst_7 : f32 to vector<16x128xf32>
    %24 = arith.maximumf %20, %23 : vector<16x128xf32>
    %25 = vector.extract_strided_slice %22 {offsets = [1, 0], sizes = [1, 128], strides = [1, 1]} : vector<16x128xf32> to vector<1x128xf32>
    %26 = vector.extract_strided_slice %22 {offsets = [14, 0], sizes = [1, 128], strides = [1, 1]} : vector<16x128xf32> to vector<1x128xf32>
    %27 = vector.extract_strided_slice %24 {offsets = [1, 0], sizes = [1, 128], strides = [1, 1]} : vector<16x128xf32> to vector<1x128xf32>
    %28 = vector.extract_strided_slice %24 {offsets = [14, 0], sizes = [1, 128], strides = [1, 1]} : vector<16x128xf32> to vector<1x128xf32>
    %29 = tpu.concatenate %25, %22, %26, %27, %24, %28 in 0 : vector<1x128xf32>, vector<16x128xf32>, vector<1x128xf32>, vector<1x128xf32>, vector<16x128xf32>, vector<1x128xf32> -> vector<36x128xf32>
    %c0_8 = arith.constant 0 : index
    %c0_9 = arith.constant 0 : index
    %30 = vector.load %arg3[%c0_8, %c0_9] : memref<128x384xf32, #tpu.memory_space<vmem>>, vector<128x384xf32>
    %cst_10 = arith.constant dense<0.000000e+00> : vector<36x384xf32>
    %31 = tpu.matmul %29, %30, %cst_10 {dimension_numbers = #tpu.dot_dimension_numbers<[1], [0], [0], [1], [0, 0, 1, 1], [], []>} : vector<36x128xf32>, vector<128x384xf32>, vector<36x384xf32> -> vector<36x384xf32>
    %32 = vector.extract_strided_slice %31 {offsets = [0, 0], sizes = [16, 128], strides = [1, 1]} : vector<36x384xf32> to vector<16x128xf32>
    %33 = vector.extract_strided_slice %31 {offsets = [1, 128], sizes = [16, 128], strides = [1, 1]} : vector<36x384xf32> to vector<16x128xf32>
    %34 = arith.addf %32, %33 : vector<16x128xf32>
    %35 = vector.extract_strided_slice %31 {offsets = [2, 256], sizes = [16, 128], strides = [1, 1]} : vector<36x384xf32> to vector<16x128xf32>
    %36 = arith.addf %34, %35 : vector<16x128xf32>
    %37 = vector.extract_strided_slice %31 {offsets = [18, 0], sizes = [16, 128], strides = [1, 1]} : vector<36x384xf32> to vector<16x128xf32>
    %38 = vector.extract_strided_slice %31 {offsets = [19, 128], sizes = [16, 128], strides = [1, 1]} : vector<36x384xf32> to vector<16x128xf32>
    %39 = arith.addf %37, %38 : vector<16x128xf32>
    %40 = vector.extract_strided_slice %31 {offsets = [20, 256], sizes = [16, 128], strides = [1, 1]} : vector<36x384xf32> to vector<16x128xf32>
    %41 = arith.addf %39, %40 : vector<16x128xf32>
    %42 = arith.addf %36, %1 : vector<16x128xf32>
    %c0_11 = arith.constant 0 : index
    %c0_12 = arith.constant 0 : index
    %c0_13 = arith.constant 0 : index
    %43 = vector.load %arg4[%c0_11, %c0_12, %c0_13] : memref<2x16x128xf32, #tpu.memory_space<vmem>>, vector<1x16x128xf32>
    %44 = vector.shape_cast %43 : vector<1x16x128xf32> to vector<16x128xf32>
    %45 = vector.shape_cast %42 : vector<16x128xf32> to vector<1x16x128xf32>
    tpu.vector_store %arg4[%c0_11, %c0_12, %c0_13], %45 {strides = array<i32>} : memref<2x16x128xf32, #tpu.memory_space<vmem>>, vector<1x16x128xf32>,
    %46 = arith.addf %41, %3 : vector<16x128xf32>
    %c1_14 = arith.constant 1 : index
    %c0_15 = arith.constant 0 : index
    %c0_16 = arith.constant 0 : index
    %47 = vector.load %arg4[%c1_14, %c0_15, %c0_16] : memref<2x16x128xf32, #tpu.memory_space<vmem>>, vector<1x16x128xf32>
    %48 = vector.shape_cast %47 : vector<1x16x128xf32> to vector<16x128xf32>
    %49 = vector.shape_cast %46 : vector<16x128xf32> to vector<1x16x128xf32>
    tpu.vector_store %arg4[%c1_14, %c0_15, %c0_16], %49 {strides = array<i32>} : memref<2x16x128xf32, #tpu.memory_space<vmem>>, vector<1x16x128xf32>,
    return
  }
  func.func @transform_0(%arg0: i32) -> (i32, i32, i32) {
    %c0_i32 = arith.constant 0 : i32
    %c0_i32_0 = arith.constant 0 : i32
    %c0_i32_1 = arith.constant 0 : i32
    return %arg0, %c0_i32, %c0_i32_0 : i32, i32, i32
  }
  func.func @transform_1(%arg0: i32) -> (i32, i32) {
    %c0_i32 = arith.constant 0 : i32
    %c0_i32_0 = arith.constant 0 : i32
    %c0_i32_1 = arith.constant 0 : i32
    return %c0_i32, %c0_i32_0 : i32, i32
  }
  func.func @transform_2(%arg0: i32) -> (i32, i32) {
    %c0_i32 = arith.constant 0 : i32
    %c0_i32_0 = arith.constant 0 : i32
    %c0_i32_1 = arith.constant 0 : i32
    return %c0_i32, %c0_i32_0 : i32, i32
  }
  func.func @transform_3(%arg0: i32) -> (i32, i32, i32) {
    %c0_i32 = arith.constant 0 : i32
    %c0_i32_0 = arith.constant 0 : i32
    %c0_i32_1 = arith.constant 0 : i32
    return %arg0, %c0_i32, %c0_i32_0 : i32, i32, i32
  }
}

</mosaic_0001>

<bundles_post_ra>
// kernel: tpu_custom_call.1
= control target key start
LH: loop header
LB: loop body
LE: loop exit
PB: predicated region body
PF: predicated region fallthrough
CT: control target
= control target key end

     0   :  { %8 = vsyncpa [#allocation3], 0  ;;  %s1725_s0 = inlined_call_operand.hbm [shape: f32[4,16,128], index: 0, kind: input, shape index: {}]   ;;  %s1726_s1 = inlined_call_operand.hbm [shape: f32[128,384], index: 1, kind: input, shape index: {}]   ;;  %s1727_s2 = inlined_call_operand.hbm [shape: f32[128,384], index: 2, kind: input, shape index: {}]   ;;  %s1728_s3 = inlined_call_operand.hbm [shape: f32[4,16,128], index: 3, kind: output, shape index: {}]  }
   0x1   :  { %10 = vsyncpa [#allocation3 + $0x1], 0 }
   0x2   :  { %11 = vsyncpa [#allocation6], 0 }
   0x3   :  { %12 = vsyncpa [#allocation4], 0 }
   0x4   :  { %14 = vsyncpa [#allocation4 + $0x1], 0  ;;  %s1405_s12 = smov 0   ;;  %s1407_s13 = smov 0  }
   0x5   :  { %s1409_s14 = smov 0   ;;  %s1411_s15 = smov 0  }
   0x6 LB: > { %s1426_s16 = sadd.s32 4294967295, %s1371_s15   ;;  %s983_s17 = sadd.s32 4294967294, %s1371_s15   ;;  %s1371_s15 = sphi %s1411_s15, %s1750_s15   ;;  %s1367_s14 = sphi %s1409_s14, %s1749_s14   ;;  %s1363_s13 = sphi %s1407_s13, %s1748_s13   ;;  %s1359_s12 = sphi %s1405_s12, %s1747_s12  }
   0x7   : > { %p40_p0 = scmp.ne.s32.totalorder %s1363_s13, %s1359_s12  ;;  %p1729_p1 = scmp.eq.s32.totalorder %s1426_s16, 0 }
   0x8   : > { %p112_p3 = scmp.eq.s32.totalorder %s983_s17, 1  ;;  %p984_p5 = scmp.ge.s32.totalorder %s1371_s15, 1 }
   0x9   : > { %p1435_p4 = por %p1729_p1, %p40_p0  ;;  %p119_p7 = scmp.lt.s32.totalorder %s1371_s15, 3 }
   0xa   : > { %p1440_p6 = por %p112_p3, %p40_p0  ;;  %s1373_s21 = smov [#allocation5]  }
   0xb   : > { %s1733_s18 = scalar_select %p1435_p4, 1, 0 }
   0xc   : > { %s1734_s19 = scalar_select %p1440_p6, 1, 0 }
   0xd   : > { %p1445_p8 = pnand %p984_p5, %p119_p7  ;;  %s131_s22 = sshll.u32 %s1373_s21, 4  ;;  %s132_s22 = int_to_ptr.vmem [resolvable:$true] %s131_s22 }
   0xe   : > { %s1374_s24 = smov [#allocation7]   ;;  %s1234_s26 = scalar_lea.vmem %s132_s22, 6144 }
   0xf   : > { %s1735_s20 = scalar_select %p1445_p8, 1, 0 }
  0x10   : > { %p1160_p9 = pneg %p1445_p8  ;;  %s144_s25 = sshll.u32 %s1374_s24, 4  ;;  %s145_s25 = int_to_ptr.vmem [resolvable:$true] %s144_s25 }
  0x11   : > { %p1235_p13 = scmp.ne.s32.totalorder %s132_s22, %s1234_s26  ;;  %p1242_p5 = scmp.lt.s32.totalorder %s132_s22, %s132_s22 }
  0x12   : > { %p1454_p11 = pnand %p1160_p9, %p1729_p1  ;;  %p1243_p7 = scmp.lt.s32.totalorder %s1234_s26, %s1234_s26 }
  0x14   : > { %p1225_p12 = pneg %p1454_p11  ;;  %p1244_p10 = por %p1243_p7, %p1242_p5 }
  0x16   : > { %p1237_p0 = pnand %p1235_p13, %p1225_p12 }
  0x18   : > { %p1238_p3 = pneg %p1237_p0 }
  0x1a   : > { %p1245_p9 = pnand %p1244_p10, %p1238_p3 }
  0x1c   : > { %1248 = shalt.err (!%p1245_p9)
}
  0x1d   : > { %s1375_s27 = smov 384   ;;  %s1376_s28 = smov 24  }
  0x1e   : > { %1163 = dma.hbm_to_vmem [thread:$0]  (!%p1454_p11), %s1726_s1, 6144, %s132_s22, [#allocation6], %s1375_s27, %s1375_s27, %s1376_s28  }
  0x1f   : > { %s1260_s4 = scalar_lea.vmem %s145_s25, 6144  ;;  %p1268_p2 = scmp.lt.s32.totalorder %s145_s25, %s145_s25 }
  0x20   : > { %p1261_p1 = scmp.ne.s32.totalorder %s145_s25, %s1260_s4  ;;  %p1269_p6 = scmp.lt.s32.totalorder %s1260_s4, %s1260_s4 }
  0x22   : > { %p1263_p13 = pnand %p1261_p1, %p1225_p12  ;;  %p1270_p5 = por %p1269_p6, %p1268_p2 }
  0x24   : > { %p1264_p0 = pneg %p1263_p13 }
  0x26   : > { %p1271_p10 = pnand %p1270_p5, %p1264_p0 }
  0x28   : > { %1274 = shalt.err (!%p1271_p10)
}
  0x29   : > { %1166 = dma.hbm_to_vmem [thread:$0]  (!%p1454_p11), %s1727_s2, 6144, %s145_s25, [#allocation6], %s1375_s27, %s1375_s27, %s1376_s28  }
  0x2a   : > { %s1477_s7 = sadd.s32 1, %s1371_s15   ;;  %s27_s8 = sadd.s32 1, %s1367_s14 }
  0x2b   : > { %s24_s9 = ssub.s32 %s1371_s15, %s1477_s7  ;;  %p34_p1 = scmp.ne.s32.totalorder %s1367_s14, %s1363_s13 }
  0x2c   : > { %p25_p2 = scmp.eq.s32.totalorder %s24_s9, 0  ;;  %p35_p6 = scmp.eq.s32.totalorder %s1371_s15, 0 }
  0x2d   : > { %p1737_p12 = scmp.eq.s32.totalorder %s1426_s16, 1  ;;  %p1177_p7 = scmp.lt.s32.totalorder %s1371_s15, 2 }
  0x2e   : > { %s1493_s11 = scalar_select %p25_p2, %s1367_s14, %s27_s8  }
  0x2f   : > { %p1487_p3 = por %p1737_p12, %p34_p1  ;;  %p36_p9 = por %p35_p6, %p34_p1 }
  0x30   : > { %s158_s17 = sand.u32 1, %s1367_s14   ;;  %s1009_s22 = sshll.u32 %s1371_s15, 9 }
  0x31   : > { %s1738_s10 = scalar_select %p1487_p3, 1, 0 }
  0x32   : > { %s988_s21 = sshll.u32 %s158_s17, 5  ;;  %s1500_s25 = scalar_lea.hbm %s1725_s0, %s1009_s22 }
  0x33   : > { %s162_s26 = scalar_lea.vmem [#allocation2], %s988_s21  ;;  %p1504_p11 = pnand %p1177_p7, %p36_p9 }
  0x34   : > { %s170_s27 = sshll.u32 %s162_s26, 4  ;;  %s1508_s29 = scalar_lea.sflag [#allocation3], %s158_s17  ;;  %s1502_s27 = int_to_ptr.vmem [resolvable:$true] %s170_s27 }
  0x35   : > { %s1275_s30 = scalar_lea.hbm %s1500_s25, 512  ;;  %p1277_p0 = pneg %p1504_p11 }
  0x36   : > { %p1276_p13 = scmp.ne.s32.totalorder %s1500_s25, %s1275_s30  ;;  %s1280_s6 = scalar_lea.hbm %s1725_s0, 1024 }
  0x37   : > { %p1281_p1 = scmp.lt.s32.totalorder %s1500_s25, %s1725_s0  ;;  %p1282_p2 = scmp.lt.s32.totalorder %s1280_s6, %s1275_s30 }
  0x38   : > { %p1278_p5 = pnand %p1277_p0, %p1276_p13 }
  0x39   : > { %p1283_p6 = por %p1282_p2, %p1281_p1 }
  0x3a   : > { %p1279_p10 = pneg %p1278_p5 }
  0x3c   : > { %p1284_p12 = pnand %p1283_p6, %p1279_p10 }
  0x3e   : > { %1287 = shalt.err (!%p1284_p12)
}
  0x3f   : > { %s1288_s17 = scalar_lea.vmem %s1502_s27, 512  ;;  %s1377_s21 = smov [#allocation2]  }
  0x40   : > { %p1289_p7 = scmp.ne.s32.totalorder %s1502_s27, %s1288_s17  ;;  %s1293_s22 = sshll.u32 %s1377_s21, 4  ;;  %s1294_s22 = int_to_ptr.vmem [resolvable:$false] %s1293_s22 }
  0x41   : > { %s1295_s23 = scalar_lea.vmem %s1294_s22, 1024  ;;  %p1296_p5 = scmp.lt.s32.totalorder %s1502_s27, %s1294_s22 }
  0x42   : > { %p1291_p9 = pnand %p1289_p7, %p1277_p0  ;;  %p1297_p3 = scmp.lt.s32.totalorder %s1295_s23, %s1288_s17 }
  0x44   : > { %p1292_p13 = pneg %p1291_p9  ;;  %p1298_p4 = por %p1297_p3, %p1296_p5 }
  0x46   : > { %p1299_p8 = pnand %p1298_p4, %p1292_p13 }
  0x48   : > { %1302 = shalt.err (!%p1299_p8)
}
  0x49   : > { %s1378_s24 = smov 128   ;;  %s1379_s26 = smov 8  }
  0x4a   : > { %1170 = dma.hbm_to_vmem [thread:$0]  (!%p1504_p11), %s1500_s25, 512, %s1502_s27, %s1508_s29, %s1378_s24, %s1378_s24, %s1379_s26  }
  0x4b   : > { %p1740_p0 = scmp.ne.s32.totalorder %s1735_s20, 0 }
  0x4c   : > { %s1532_s30 = sand.u32 (!%p1740_p0), 1, %s1363_s13   ;;  %p1741_p4 = scmp.ne.s32.totalorder (!%p1740_p0), %s1733_s18, 0 }
  0x4d   : > { %182 = sbr.rel (%p1740_p0) target bundleno = 567 (0x237), region = 32  ;;  %s993_s4 = sshll.u32 (!%p1740_p0), %s1532_s30, 5 }
  0x4e   : > { %s185_s5 = scalar_lea.sflag (!%p1740_p0), [#allocation3], %s1532_s30  ;;  %s1538_s6 = scalar_lea.vmem (!%p1740_p0), [#allocation2], %s993_s4 }
  0x52   : > { %1346 = dma.done.wait (%p1741_p4), %s185_s5, 512  }
  0x53   : > { %1348 = vsyncadd (%p1741_p4), %s185_s5, 4294966784  ;;  %p1742_p8 = scmp.eq.s32.totalorder %s1426_s16, 0 }
  0x55   : > { %1350 = dma.done.wait (%p1742_p8), [#allocation6], 12288   ;;  %p1743_p3 = pmov %p1742_p8 }
  0x56   : > { %v1380_v0 = vmov 0.0   ;;  %vm1381_vm0 = vmmov 0   ;;  %v304_v1 = vld [vmem:[#allocation5 + $0x170] sm:$0xff]  ;;  %v303_v2 = vld [vmem:[#allocation5 + $0x168] sm:$0xff]  ;;  %v305_v3 = vld [vmem:[#allocation5 + $0x178] sm:$0xff]  ;;  %vm230_vm1 = vcmask 1040384  }
  0x57   : > { %1352 = vsyncadd (%p1743_p3), [#allocation6], 4294955008  ;;  %1054 = vmatprep.subr.mxu1 %v1380_v0  ;;  %370 = vmatprep.mubr.f32.mxu0 %v1380_v0  ;;  %v301_v4 = vld [vmem:[#allocation5 + $0x158] sm:$0xff]  ;;  %v300_v5 = vld [vmem:[#allocation5 + $0x150] sm:$0xff]  ;;  %vm254_vm2 = vcmask 1041408   ;;  %vm243_vm3 = vcmask 1042432  }
  0x58   : > { %1086 = vmatprep.mubr.msk.f32.mxu1 %vm1381_vm0, %v1380_v0  ;;  %306 = vmatprep.subr.mxu0 %v304_v1  ;;  %v302_v6 = vld [vmem:[#allocation5 + $0x160] sm:$0xff]  ;;  %v299_v8 = vld [vmem:[#allocation5 + $0x148] sm:$0xff]  ;;  %v297_v9 = vld [vmem:[#allocation5 + $0x138] sm:$0xff]  ;;  %vm494_vm4 = vcmask 1046528   ;;  %vm507_vm5 = vcmask 1045504   ;;  %s1659_s18 = scalar_lea.vmem [#allocation8], %s993_s4 }
  0x59   : > { %1055 = vmatpush3.msra.mxu1 %v305_v3  ;;  %307 = vmatpush1.msra.mxu0 %v303_v2  ;;  %v298_v7 = vld [vmem:[#allocation5 + $0x140] sm:$0xff]  ;;  %v295_v10 = vld [vmem:[#allocation5 + $0x128] sm:$0xff]  ;;  %v296_v11 = vld [vmem:[#allocation5 + $0x130] sm:$0xff]  ;;  %s1011_s20 = sshll.u32 %s1426_s16, 9  ;;  %s891_s25 = sshll.u32 %s1659_s18, 4  ;;  %s1680_s25 = int_to_ptr.vmem [resolvable:$true] %s891_s25 }
  0x5a   : > { %1056 = vmatprep.subr.mxu1 %v1380_v0  ;;  %308 = vmatprep.subr.mxu0 %v301_v4  ;;  %v294_v12 = vld [vmem:[#allocation5 + $0x120] sm:$0xff]  ;;  %v292_v13 = vld [vmem:[#allocation5 + $0x110] sm:$0xff]  ;;  %v293_v14 = vld [vmem:[#allocation5 + $0x118] sm:$0xff]  ;;  %s1678_s29 = scalar_lea.hbm %s1728_s3, %s1011_s20  ;;  %s877_s16 = scalar_lea.sflag [#allocation4], %s1532_s30 }
  0x5b   : > { %1057 = vmatpush3.msra.mxu1 %v302_v6  ;;  %309 = vmatpush1.msra.mxu0 %v300_v5  ;;  %v291_v15 = vld [vmem:[#allocation5 + $0x108] sm:$0xff]  ;;  %v289_v16 = vld [vmem:[#allocation5 + $0xf8] sm:$0xff]  ;;  %v290_v17 = vld [vmem:[#allocation5 + $0x100] sm:$0xff]  ;;  %s1303_s8 = scalar_lea.vmem %s1680_s25, 512  ;;  %p1744_p10 = scmp.ne.s32.totalorder %s1738_s10, 0 }
  0x5c   : > { %1058 = vmatprep.subr.mxu1 %v1380_v0  ;;  %310 = vmatprep.subr.mxu0 %v298_v7  ;;  %v288_v18 = vld [vmem:[#allocation5 + $0xf0] sm:$0xff]  ;;  %v286_v19 = vld [vmem:[#allocation5 + $0xe0] sm:$0xff]  ;;  %v287_v20 = vld [vmem:[#allocation5 + $0xe8] sm:$0xff]  ;;  %p1304_p11 = scmp.ne.s32.totalorder %s1680_s25, %s1303_s8  ;;  %s1382_s9 = smov [#allocation8]  }
  0x5d   : > { %1059 = vmatpush3.msra.mxu1 %v299_v8  ;;  %311 = vmatpush1.msra.mxu0 %v297_v9  ;;  %v285_v21 = vld [vmem:[#allocation5 + $0xd8] sm:$0xff]  ;;  %v283_v22 = vld [vmem:[#allocation5 + $0xc8] sm:$0xff]  ;;  %v284_v23 = vld [vmem:[#allocation5 + $0xd0] sm:$0xff]  ;;  %s1307_s17 = sshll.u32 %s1382_s9, 4  ;;  %s1308_s17 = int_to_ptr.vmem [resolvable:$false] %s1307_s17 }
  0x5e   : > { %1060 = vmatprep.subr.mxu1 %v1380_v0  ;;  %312 = vmatprep.subr.mxu0 %v295_v10  ;;  %v282_v24 = vld [vmem:[#allocation5 + $0xc0] sm:$0xff]  ;;  %v280_v25 = vld [vmem:[#allocation5 + $0xb0] sm:$0xff]  ;;  %v281_v26 = vld [vmem:[#allocation5 + $0xb8] sm:$0xff]  ;;  %p1305_p1 = pnand %p1304_p11, %p1744_p10  ;;  %s1309_s21 = scalar_lea.vmem %s1308_s17, 1024 }
  0x5f   : > { %1061 = vmatpush3.msra.mxu1 %v296_v11  ;;  %313 = vmatpush1.msra.mxu0 %v294_v12  ;;  %v279_v27 = vld [vmem:[#allocation5 + $0xa8] sm:$0xff]  ;;  %v277_v28 = vld [vmem:[#allocation5 + $0x98] sm:$0xff]  ;;  %v278_v29 = vld [vmem:[#allocation5 + $0xa0] sm:$0xff]  ;;  %p1310_p6 = scmp.lt.s32.totalorder %s1680_s25, %s1308_s17  ;;  %p1311_p12 = scmp.lt.s32.totalorder %s1309_s21, %s1303_s8 }
  0x60   : > { %1062 = vmatprep.subr.mxu1 %v1380_v0  ;;  %314 = vmatprep.subr.mxu0 %v292_v13  ;;  %v276_v30 = vld [vmem:[#allocation5 + $0x90] sm:$0xff]  ;;  %v274_v31 = vld [vmem:[#allocation5 + $0x80] sm:$0xff]  ;;  %v275_v32 = vld [vmem:[#allocation5 + $0x88] sm:$0xff]  ;;  %p1306_p2 = pneg %p1305_p1 }
  0x61   : > { %1063 = vmatpush3.msra.mxu1 %v293_v14  ;;  %315 = vmatpush1.msra.mxu0 %v291_v15  ;;  %v273_v33 = vld [vmem:[#allocation5 + $0x78] sm:$0xff]  ;;  %v271_v34 = vld [vmem:[#allocation5 + $0x68] sm:$0xff]  ;;  %v272_v35 = vld [vmem:[#allocation5 + $0x70] sm:$0xff]  ;;  %p1312_p7 = por %p1311_p12, %p1310_p6 }
  0x62   : > { %1064 = vmatprep.subr.mxu1 %v1380_v0  ;;  %316 = vmatprep.subr.mxu0 %v289_v16  ;;  %v270_v36 = vld [vmem:[#allocation5 + $0x60] sm:$0xff]  ;;  %v268_v37 = vld [vmem:[#allocation5 + $0x50] sm:$0xff]  ;;  %v269_v38 = vld [vmem:[#allocation5 + $0x58] sm:$0xff] }
  0x63   : > { %1065 = vmatpush3.msra.mxu1 %v290_v17  ;;  %317 = vmatpush1.msra.mxu0 %v288_v18  ;;  %v1564_v39 = vld [vmem:[%s1538_s6] sm:$0xff]  ;;  %v267_v40 = vld [vmem:[#allocation5 + $0x48] sm:$0xff]  ;;  %v265_v41 = vld [vmem:[#allocation5 + $0x38] sm:$0xff]  ;;  %p1313_p9 = pnand %p1312_p7, %p1306_p2 }
  0x64   : > { %1066 = vmatprep.subr.mxu1 %v1380_v0  ;;  %318 = vmatprep.subr.mxu0 %v286_v19  ;;  %v266_v42 = vld [vmem:[#allocation5 + $0x40] sm:$0xff]  ;;  %v264_v43 = vld [vmem:[#allocation5 + $0x30] sm:$0xff]  ;;  %v227_v44 = vrot.slane %v1564_v39, 1  ;;  %v231_v45 = vrot.slane %v1564_v39, 7  ;;  %v263_v47 = vld [vmem:[#allocation5 + $0x28] sm:$0xff] }
  0x65   : > { %1067 = vmatpush3.msra.mxu1 %v287_v20  ;;  %319 = vmatpush1.msra.mxu0 %v285_v21  ;;  %v262_v46 = vld [vmem:[#allocation5 + $0x20] sm:$0xff]  ;;  %v1571_v48 = vld [vmem:[%s1538_s6 + $0x8] sm:$0xff]  ;;  %v261_v49 = vld [vmem:[#allocation5 + $0x18] sm:$0xff] }
  0x66   : > { %1068 = vmatprep.subr.mxu1 %v1380_v0  ;;  %320 = vmatprep.subr.mxu0 %v283_v22  ;;  %v1574_v50 = vld [vmem:[%s1538_s6 + $0x10] sm:$0xff]  ;;  %v237_v51 = vrot.slane %v1571_v48, 5  ;;  %v259_v52 = vld [vmem:[#allocation5 + $0x8] sm:$0xff]  ;;  %v258_v54 = vld [vmem:[#allocation5] sm:$0xff]  ;;  %v252_v55 = vsel %vm230_vm1, %v227_v44, %v231_v45  ;;  %v232_v56 = vrot.slane %v1571_v48, 7 }
  0x67   : > { %1069 = vmatpush3.msra.mxu1 %v284_v23  ;;  %321 = vmatpush1.msra.mxu0 %v282_v24  ;;  %v260_v53 = vld [vmem:[#allocation5 + $0x10] sm:$0xff]  ;;  %v240_v57 = vrot.slane %v1574_v50, 7  ;;  %v623_v60 = vld [vmem:[#allocation7 + $0x168] sm:$0xff]  ;;  %v244_v62 = vrot.slane %v1574_v50, 5  ;;  %v621_v63 = vld [vmem:[#allocation7 + $0x158] sm:$0xff] }
  0x68   : > { %1070 = vmatprep.subr.mxu1 %v1380_v0  ;;  %322 = vmatprep.subr.mxu0 %v280_v25  ;;  %v253_v58 = vsel %vm230_vm1, %v232_v56, %v237_v51  ;;  %v624_v59 = vld [vmem:[#allocation7 + $0x170] sm:$0xff]  ;;  %v233_v61 = vsel %vm230_vm1, %v231_v45, %v232_v56  ;;  %v1590_v2 = vld [vmem:[%s1538_s6 + $0x18] sm:$0xff]  ;;  %v618_v7 = vld [vmem:[#allocation7 + $0x140] sm:$0xff] }
  0x69   : > { %1071 = vmatpush3.msra.mxu1 %v281_v26  ;;  %323 = vmatpush1.msra.mxu0 %v279_v27  ;;  %v255_v1 = vsel %vm254_vm2, %v253_v58, %v240_v57  ;;  %v625_v3 = vld [vmem:[#allocation7 + $0x178] sm:$0xff]  ;;  %v620_v4 = vld [vmem:[#allocation7 + $0x150] sm:$0xff]  ;;  %v245_v6 = vrot.slane %v1590_v2, 5  ;;  %v622_v8 = vld [vmem:[#allocation7 + $0x160] sm:$0xff]  ;;  %v250_v11 = vrot.slane %v1590_v2, 3 }
  0x6a   : > { %1072 = vmatprep.subr.mxu1 %v1380_v0  ;;  %324 = vmatprep.subr.mxu0 %v277_v28  ;;  %v256_v5 = vsel %vm243_vm3, %v255_v1, %v244_v62  ;;  %v617_v9 = vld [vmem:[#allocation7 + $0x138] sm:$0xff]  ;;  %v615_v12 = vld [vmem:[#allocation7 + $0x128] sm:$0xff]  ;;  %v614_v14 = vld [vmem:[#allocation7 + $0x120] sm:$0xff] }
  0x6b   : > { %1073 = vmatpush3.msra.mxu1 %v278_v29  ;;  %325 = vmatpush1.msra.mxu0 %v276_v30  ;;  %v246_v10 = vsel %vm243_vm3, %v244_v62, %v245_v6  ;;  %v619_v13 = vld [vmem:[#allocation7 + $0x148] sm:$0xff]  ;;  %v257_v15 = vsel %vm243_vm3, %v245_v6, %v250_v11  ;;  %v612_v16 = vld [vmem:[#allocation7 + $0x110] sm:$0xff]  ;;  %v613_v19 = vld [vmem:[#allocation7 + $0x118] sm:$0xff] }
  0x6c   : > { %1074 = vmatprep.subr.mxu1 %v1380_v0  ;;  %326 = vmatprep.subr.mxu0 %v274_v31  ;;  %v616_v17 = vld [vmem:[#allocation7 + $0x130] sm:$0xff]  ;;  %v611_v18 = vld [vmem:[#allocation7 + $0x108] sm:$0xff]  ;;  %v609_v20 = vld [vmem:[#allocation7 + $0xf8] sm:$0xff] }
  0x6d   : > { %1075 = vmatpush3.msra.mxu1 %v275_v32  ;;  %327 = vmatpush1.msra.mxu0 %v273_v33  ;;  %v608_v21 = vld [vmem:[#allocation7 + $0xf0] sm:$0xff]  ;;  %v610_v22 = vld [vmem:[#allocation7 + $0x100] sm:$0xff]  ;;  %v605_v24 = vld [vmem:[#allocation7 + $0xd8] sm:$0xff] }
  0x6e   : > { %1076 = vmatprep.subr.mxu1 %v1380_v0  ;;  %328 = vmatprep.subr.mxu0 %v271_v34  ;;  %v606_v23 = vld [vmem:[#allocation7 + $0xe0] sm:$0xff]  ;;  %v607_v25 = vld [vmem:[#allocation7 + $0xe8] sm:$0xff]  ;;  %v604_v28 = vld [vmem:[#allocation7 + $0xd0] sm:$0xff] }
  0x6f   : > { %1077 = vmatpush3.msra.mxu1 %v272_v35  ;;  %329 = vmatpush1.msra.mxu0 %v270_v36  ;;  %v603_v26 = vld [vmem:[#allocation7 + $0xc8] sm:$0xff]  ;;  %v602_v27 = vld [vmem:[#allocation7 + $0xc0] sm:$0xff]  ;;  %v600_v29 = vld [vmem:[#allocation7 + $0xb0] sm:$0xff] }
  0x70   : > { %1078 = vmatprep.subr.mxu1 %v1380_v0  ;;  %330 = vmatprep.subr.mxu0 %v268_v37  ;;  %v599_v30 = vld [vmem:[#allocation7 + $0xa8] sm:$0xff]  ;;  %v601_v31 = vld [vmem:[#allocation7 + $0xb8] sm:$0xff]  ;;  %v596_v33 = vld [vmem:[#allocation7 + $0x90] sm:$0xff] }
  0x71   : > { %1079 = vmatpush3.msra.mxu1 %v269_v38  ;;  %331 = vmatpush1.msra.mxu0 %v267_v40  ;;  %v597_v32 = vld [vmem:[#allocation7 + $0x98] sm:$0xff]  ;;  %v598_v34 = vld [vmem:[#allocation7 + $0xa0] sm:$0xff]  ;;  %v595_v37 = vld [vmem:[#allocation7 + $0x88] sm:$0xff] }
  0x72   : > { %1080 = vmatprep.subr.mxu1 %v1380_v0  ;;  %332 = vmatprep.subr.mxu0 %v265_v41  ;;  %v594_v35 = vld [vmem:[#allocation7 + $0x80] sm:$0xff]  ;;  %v593_v36 = vld [vmem:[#allocation7 + $0x78] sm:$0xff]  ;;  %v591_v38 = vld [vmem:[#allocation7 + $0x68] sm:$0xff] }
  0x73   : > { %1081 = vmatpush3.msra.mxu1 %v266_v42  ;;  %333 = vmatpush1.msra.mxu0 %v264_v43  ;;  %v590_v40 = vld [vmem:[#allocation7 + $0x60] sm:$0xff]  ;;  %v592_v41 = vld [vmem:[#allocation7 + $0x70] sm:$0xff]  ;;  %v587_v43 = vld [vmem:[#allocation7 + $0x48] sm:$0xff] }
  0x74   : > { %1082 = vmatprep.subr.mxu1 %v1380_v0  ;;  %334 = vmatprep.subr.mxu0 %v262_v46  ;;  %v588_v42 = vld [vmem:[#allocation7 + $0x50] sm:$0xff]  ;;  %v589_v44 = vld [vmem:[#allocation7 + $0x58] sm:$0xff] }
  0x75   : > { %1083 = vmatpush3.msra.mxu1 %v263_v47  ;;  %335 = vmatpush1.msra.mxu0 %v261_v49  ;;  %v585_v45 = vld [vmem:[#allocation7 + $0x38] sm:$0xff]  ;;  %v584_v46 = vld [vmem:[#allocation7 + $0x30] sm:$0xff]  ;;  %v586_v47 = vld [vmem:[#allocation7 + $0x40] sm:$0xff] }
  0x76   : > { %1084 = vmatprep.subr.mxu1 %v1380_v0  ;;  %336 = vmatprep.subr.mxu0 %v259_v52  ;;  %v582_v49 = vld [vmem:[#allocation7 + $0x20] sm:$0xff]  ;;  %v581_v51 = vld [vmem:[#allocation7 + $0x18] sm:$0xff]  ;;  %v583_v52 = vld [vmem:[#allocation7 + $0x28] sm:$0xff] }
  0x77   : > { %1085 = vmatpush3.msra.mxu1 %v260_v53  ;;  %337 = vmatpush1.msra.mxu0 %v258_v54  ;;  %v579_v53 = vld [vmem:[#allocation7 + $0x8] sm:$0xff]  ;;  %v578_v54 = vld [vmem:[#allocation7] sm:$0xff] }
  0x78   : > { %1087 = vmatmul.mubr.f32.vlgmr.msra.gmra.mxu1 %v252_v55  ;;  %371 = vmatmul.mubr.f32.vlgmr.msra.gmra.mxu0 %v252_v55  ;;  %v580_v55 = vld [vmem:[#allocation7 + $0x10] sm:$0xff] }
  0x79   : > { %1089 = vmatprep.mubr.msk.f32.mxu1 %vm1381_vm0, %v1380_v0  ;;  %376 = vmatprep.mubr.f32.mxu0 %v1380_v0 }
  0x7a   : > { %626 = vmatprep.subr.mxu0 %v624_v59  ;;  %1101 = vmatprep.subr.mxu1 %v1380_v0 }
  0x7b   : > { %627 = vmatpush1.msra.mxu0 %v623_v60  ;;  %1102 = vmatpush3.msra.mxu1 %v625_v3 }
  0x7c   : > { %1090 = vmatmul.mubr.f32.gmra.mxu1 %v233_v61  ;;  %628 = vmatprep.subr.mxu0 %v621_v63 }
  0x7d   : > { %377 = vmatmul.mubr.f32.gmra.mxu0 %v233_v61  ;;  %1092 = vmatprep.mubr.msk.f32.mxu1 %vm1381_vm0, %v1380_v0 }
  0x7e   : > { %382 = vmatprep.mubr.f32.mxu0 %v1380_v0  ;;  %1103 = vmatprep.subr.mxu1 %v1380_v0 }
  0x7f   : > { %629 = vmatpush1.msra.mxu0 %v620_v4  ;;  %1104 = vmatpush3.msra.mxu1 %v622_v8 }
  0x80   : > { %1093 = vmatmul.mubr.f32.gmra.mxu1 %v256_v5  ;;  %630 = vmatprep.subr.mxu0 %v618_v7 }
  0x81   : > { %383 = vmatmul.mubr.f32.gmra.mxu0 %v256_v5  ;;  %1095 = vmatprep.mubr.msk.f32.mxu1 %vm1381_vm0, %v1380_v0 }
  0x82   : > { %388 = vmatprep.mubr.f32.mxu0 %v1380_v0  ;;  %1105 = vmatprep.subr.mxu1 %v1380_v0 }
  0x83   : > { %631 = vmatpush1.msra.mxu0 %v617_v9  ;;  %1106 = vmatpush3.msra.mxu1 %v619_v13 }
  0x84   : > { %1096 = vmatmul.mubr.f32.gmra.mxu1 %v246_v10  ;;  %632 = vmatprep.subr.mxu0 %v615_v12 }
  0x85   : > { %389 = vmatmul.mubr.f32.gmra.mxu0 %v246_v10  ;;  %1098 = vmatprep.mubr.msk.f32.mxu1 %vm1381_vm0, %v1380_v0 }
  0x86   : > { %394 = vmatprep.mubr.f32.mxu0 %v1380_v0  ;;  %1107 = vmatprep.subr.mxu1 %v1380_v0 }
  0x87   : > { %633 = vmatpush1.msra.mxu0 %v614_v14  ;;  %1108 = vmatpush3.msra.mxu1 %v616_v17 }
  0x88   : > { %1099 = vmatmul.mubr.f32.gmra.mxu1 %v257_v15  ;;  %634 = vmatprep.subr.mxu0 %v612_v16 }
  0x89   : > { %395 = vmatmul.mubr.f32.gmra.mxu0 %v257_v15  ;;  %1109 = vmatprep.subr.mxu1 %v1380_v0 }
  0x8a   : > { %635 = vmatpush1.msra.mxu0 %v611_v18  ;;  %1110 = vmatpush3.msra.mxu1 %v613_v19 }
  0x8b   : > { %636 = vmatprep.subr.mxu0 %v609_v20  ;;  %1111 = vmatprep.subr.mxu1 %v1380_v0 }
  0x8c   : > { %637 = vmatpush1.msra.mxu0 %v608_v21  ;;  %1112 = vmatpush3.msra.mxu1 %v610_v22 }
  0x8d   : > { %638 = vmatprep.subr.mxu0 %v606_v23  ;;  %1113 = vmatprep.subr.mxu1 %v1380_v0 }
  0x8e   : > { %690 = vmatprep.mubr.f32.mxu0 %v1380_v0  ;;  %1133 = vmatprep.mubr.msk.f32.mxu1 %vm1381_vm0, %v1380_v0 }
  0x8f   : > { %639 = vmatpush1.msra.mxu0 %v605_v24  ;;  %1114 = vmatpush3.msra.mxu1 %v607_v25 }
  0x90   : > { %640 = vmatprep.subr.mxu0 %v603_v26  ;;  %1115 = vmatprep.subr.mxu1 %v1380_v0 }
  0x91   : > { %641 = vmatpush1.msra.mxu0 %v602_v27  ;;  %1116 = vmatpush3.msra.mxu1 %v604_v28 }
  0x92   : > { %642 = vmatprep.subr.mxu0 %v600_v29  ;;  %1117 = vmatprep.subr.mxu1 %v1380_v0 }
  0x93   : > { %643 = vmatpush1.msra.mxu0 %v599_v30  ;;  %1118 = vmatpush3.msra.mxu1 %v601_v31 }
  0x94   : > { %644 = vmatprep.subr.mxu0 %v597_v32  ;;  %1119 = vmatprep.subr.mxu1 %v1380_v0 }
  0x95   : > { %645 = vmatpush1.msra.mxu0 %v596_v33  ;;  %1120 = vmatpush3.msra.mxu1 %v598_v34 }
  0x96   : > { %646 = vmatprep.subr.mxu0 %v594_v35  ;;  %1121 = vmatprep.subr.mxu1 %v1380_v0 }
  0x97   : > { %647 = vmatpush1.msra.mxu0 %v593_v36  ;;  %1122 = vmatpush3.msra.mxu1 %v595_v37 }
  0x98   : > { %648 = vmatprep.subr.mxu0 %v591_v38  ;;  %1123 = vmatprep.subr.mxu1 %v1380_v0 }
  0x99   : > { %649 = vmatpush1.msra.mxu0 %v590_v40  ;;  %1124 = vmatpush3.msra.mxu1 %v592_v41 }
  0x9a   : > { %650 = vmatprep.subr.mxu0 %v588_v42  ;;  %1125 = vmatprep.subr.mxu1 %v1380_v0 }
  0x9b   : > { %651 = vmatpush1.msra.mxu0 %v587_v43  ;;  %1126 = vmatpush3.msra.mxu1 %v589_v44 }
  0x9c   : > { %652 = vmatprep.subr.mxu0 %v585_v45  ;;  %1127 = vmatprep.subr.mxu1 %v1380_v0 }
  0x9d   : > { %653 = vmatpush1.msra.mxu0 %v584_v46  ;;  %1128 = vmatpush3.msra.mxu1 %v586_v47 }
  0x9e   : > { %654 = vmatprep.subr.mxu0 %v582_v49  ;;  %1129 = vmatprep.subr.mxu1 %v1380_v0 }
  0x9f   : > { %655 = vmatpush1.msra.mxu0 %v581_v51  ;;  %1130 = vmatpush3.msra.mxu1 %v583_v52 }
  0xa0   : > { %656 = vmatprep.subr.mxu0 %v579_v53  ;;  %1131 = vmatprep.subr.mxu1 %v1380_v0 }
  0xa1   : > { %657 = vmatpush1.msra.mxu0 %v578_v54  ;;  %1132 = vmatpush3.msra.mxu1 %v580_v55 }
 0x138   : > { %v467_v56 = vpop.f32.mrf.mxu1  ;;  %v372_v57 = vpop.f32.mrf.mxu0 }
 0x139   : > { %v508_v1 = vrot.slane %v467_v56, 2 }
 0x13a   : > { %v1088_v58 = vpop.f32.mrf.mxu1  ;;  %v374_v59 = vpop.f32.mrf.mxu0 }
 0x13b   : > { %v495_v3 = vrot.slane %v374_v59, 1 }
 0x13c   : > { %v472_v60 = vpop.f32.mrf.mxu1 }
 0x13d   : > { %v378_v61 = vpop.f32.mrf.mxu0  ;;  %v509_v4 = vrot.slane %v472_v60, 2 }
 0x13e   : > { %v1091_v62 = vpop.f32.mrf.mxu1 }
 0x13f   : > { %v380_v63 = vpop.f32.mrf.mxu0  ;;  %v510_v12 = vsel %vm507_vm5, %v508_v1, %v509_v4 }
 0x140   : > { %v496_v5 = vrot.slane %v380_v63, 1  ;;  %v477_v6 = vpop.f32.mrf.mxu1 }
 0x141   : > { %v384_v7 = vpop.f32.mrf.mxu0  ;;  %v511_v13 = vrot.slane %v477_v6, 2 }
 0x142   : > { %v497_v8 = vsel %vm494_vm4, %v495_v3, %v496_v5  ;;  %v1094_v9 = vpop.f32.mrf.mxu1 }
 0x143   : > { %v502_v10 = vadd.f32 %v497_v8, %v372_v57  ;;  %v386_v11 = vpop.f32.mrf.mxu0  ;;  %v512_v23 = vsel %vm507_vm5, %v509_v4, %v511_v13 }
 0x144   : > { %v498_v14 = vrot.slane %v386_v11, 1  ;;  %v482_v15 = vpop.f32.mrf.mxu1 }
 0x145   : > { %v515_v16 = vadd.f32 %v510_v12, %v502_v10  ;;  %v390_v17 = vpop.f32.mrf.mxu0  ;;  %v531_v24 = vrot.slane %v482_v15, 2 }
 0x146   : > { %v499_v18 = vsel %vm494_vm4, %v496_v5, %v498_v14  ;;  %v1097_v19 = vpop.f32.mrf.mxu1 }
 0x147   : > { %v541_v20 = vmax.f32 %v515_v16, 0.0  ;;  %v503_v21 = vadd.f32 %v499_v18, %v378_v61  ;;  %v392_v22 = vpop.f32.mrf.mxu0  ;;  %v532_v37 = vsel %vm507_vm5, %v511_v13, %v531_v24 }
 0x148   : > { %v519_v25 = vrot.slane %v392_v22, 1  ;;  %v487_v26 = vpop.f32.mrf.mxu1 }
 0x149   : > { %v516_v27 = vadd.f32 %v512_v23, %v503_v21  ;;  %v396_v28 = vpop.f32.mrf.mxu0  ;;  %v547_v29 = vrot.slane %v541_v20, 1  ;;  %v550_v30 = vrot.slane %v541_v20, 7  ;;  %v533_v38 = vrot.slane %v487_v26, 2 }
 0x14a   : > { %v520_v31 = vsel %vm494_vm4, %v498_v14, %v519_v25  ;;  %v1100_v32 = vpop.f32.mrf.mxu1 }
 0x14b   : > { %v526_v33 = vadd.f32 %v520_v31, %v384_v7  ;;  %v398_v34 = vpop.f32.mrf.mxu0  ;;  %v573_v35 = vsel %vm230_vm1, %v547_v29, %v550_v30  ;;  %v542_v36 = vmax.f32 %v516_v27, 0.0  ;;  %v534_v51 = vsel %vm507_vm5, %v531_v24, %v533_v38 }
 0x14c   : > { %v521_v40 = vrot.slane %v398_v34, 1  ;;  %691 = vmatmul.mubr.f32.vlgmr.msra.gmra.mxu0 %v573_v35  ;;  %1134 = vmatmul.mubr.f32.vlgmr.msra.gmra.mxu1 %v573_v35 }
 0x14d   : > { %v538_v41 = vadd.f32 %v532_v37, %v526_v33  ;;  %696 = vmatprep.mubr.f32.mxu0 %v1380_v0  ;;  %1136 = vmatprep.mubr.msk.f32.mxu1 %vm1381_vm0, %v1380_v0  ;;  %v551_v42 = vrot.slane %v542_v36, 7  ;;  %v556_v45 = vrot.slane %v542_v36, 5 }
 0x14e   : > { %v522_v43 = vsel %vm494_vm4, %v519_v25, %v521_v40  ;;  %v528_v44 = vadd.f32 %v521_v40, %v396_v28  ;;  %v863_v40 = vrot.slane %v1574_v50, 6 }
 0x14f   : > { %v527_v46 = vadd.f32 %v522_v43, %v390_v17  ;;  %v552_v47 = vsel %vm230_vm1, %v550_v30, %v551_v42  ;;  %v543_v49 = vmax.f32 %v538_v41, 0.0  ;;  %v574_v57 = vsel %vm230_vm1, %v551_v42, %v556_v45 }
 0x150   : > { %v540_v52 = vadd.f32 %v533_v38, %v528_v44  ;;  %697 = vmatmul.mubr.f32.gmra.mxu0 %v552_v47  ;;  %1137 = vmatmul.mubr.f32.gmra.mxu1 %v552_v47 }
 0x151   : > { %702 = vmatprep.mubr.f32.mxu0 %v1380_v0  ;;  %1139 = vmatprep.mubr.msk.f32.mxu1 %vm1381_vm0, %v1380_v0  ;;  %v559_v53 = vrot.slane %v543_v49, 1  ;;  %v563_v54 = vrot.slane %v543_v49, 7  ;;  %v539_v55 = vadd.f32 %v534_v51, %v527_v46  ;;  %v864_v49 = vrot.slane %v1590_v2, 6 }
 0x152   : > { %v545_v56 = vmax.f32 %v540_v52, 0.0 }
 0x153   : > { %v575_v58 = vsel %vm254_vm2, %v574_v57, %v559_v53  ;;  %v544_v59 = vmax.f32 %v539_v55, 0.0 }
 0x154   : > { %v576_v60 = vsel %vm243_vm3, %v575_v58, %v563_v54  ;;  %v566_v61 = vrot.slane %v545_v56, 7  ;;  %v571_v3 = vrot.slane %v545_v56, 5  ;;  %v865_v56 = vsel %vm254_vm2, %v863_v40, %v864_v49 }
 0x155   : > { %703 = vmatmul.mubr.f32.gmra.mxu0 %v576_v60  ;;  %1140 = vmatmul.mubr.f32.gmra.mxu1 %v576_v60  ;;  %v564_v62 = vrot.slane %v544_v59, 7 }
 0x156   : > { %708 = vmatprep.mubr.f32.mxu0 %v1380_v0  ;;  %1142 = vmatprep.mubr.msk.f32.mxu1 %vm1381_vm0, %v1380_v0 }
 0x157   : > { %v565_v63 = vsel %vm230_vm1, %v563_v54, %v564_v62  ;;  %v567_v1 = vsel %vm230_vm1, %v564_v62, %v566_v61 }
 0x158   : > { %v577_v4 = vsel %vm243_vm3, %v567_v1, %v571_v3 }
 0x159   : > { %709 = vmatmul.mubr.f32.gmra.mxu0 %v565_v63  ;;  %1143 = vmatmul.mubr.f32.gmra.mxu1 %v565_v63 }
 0x15a   : > { %714 = vmatprep.mubr.f32.mxu0 %v1380_v0  ;;  %1145 = vmatprep.mubr.msk.f32.mxu1 %vm1381_vm0, %v1380_v0 }
 0x15d   : > { %715 = vmatmul.mubr.f32.gmra.mxu0 %v577_v4  ;;  %1146 = vmatmul.mubr.f32.gmra.mxu1 %v577_v4 }
 0x20c   : > { %v692_v5 = vpop.f32.mrf.mxu0  ;;  %v787_v6 = vpop.f32.mrf.mxu1 }
 0x20d   : > { %v826_v16 = vrot.slane %v787_v6, 2 }
 0x20e   : > { %v694_v7 = vpop.f32.mrf.mxu0  ;;  %v1135_v8 = vpop.f32.mrf.mxu1 }
 0x20f   : > { %v814_v13 = vrot.slane %v694_v7, 1 }
 0x210   : > { %v698_v9 = vpop.f32.mrf.mxu0  ;;  %v792_v10 = vpop.f32.mrf.mxu1 }
 0x211   : > { %v827_v14 = vrot.slane %v792_v10, 2 }
 0x212   : > { %v700_v11 = vpop.f32.mrf.mxu0  ;;  %v1138_v12 = vpop.f32.mrf.mxu1 }
 0x213   : > { %v815_v15 = vrot.slane %v700_v11, 1  ;;  %v828_v20 = vsel %vm507_vm5, %v826_v16, %v827_v14 }
 0x215   : > { %v816_v17 = vsel %vm494_vm4, %v814_v13, %v815_v15  ;;  %v704_v0 = vpop.f32.mrf.mxu0  ;;  %v797_v18 = vpop.f32.mrf.mxu1 }
 0x216   : > { %v821_v19 = vadd.f32 %v816_v17, %v692_v5  ;;  %v829_v24 = vrot.slane %v797_v18, 2 }
 0x217   : > { %v706_v21 = vpop.f32.mrf.mxu0  ;;  %v1141_v22 = vpop.f32.mrf.mxu1 }
 0x218   : > { %v833_v23 = vadd.f32 %v828_v20, %v821_v19  ;;  %v817_v25 = vrot.slane %v706_v21, 1  ;;  %v830_v33 = vsel %vm507_vm5, %v827_v14, %v829_v24 }
 0x219   : > { %v710_v26 = vpop.f32.mrf.mxu0  ;;  %v802_v27 = vpop.f32.mrf.mxu1 }
 0x21a   : > { %v859_v28 = vadd.f32 %v833_v23, %v1564_v39  ;;  %v818_v29 = vsel %vm494_vm4, %v815_v15, %v817_v25  ;;  %v849_v34 = vrot.slane %v802_v27, 2 }
 0x21b   : > { %v822_v30 = vadd.f32 %v818_v29, %v698_v9  ;;  %v712_v31 = vpop.f32.mrf.mxu0  ;;  %v1144_v32 = vpop.f32.mrf.mxu1 }
 0x21c   : > { %861 = vst [vmem:[%s1659_s18] sm:$0xff] %v859_v28  ;;  %v837_v35 = vrot.slane %v712_v31, 1  ;;  %v850_v45 = vsel %vm507_vm5, %v829_v24, %v849_v34 }
 0x21d   : > { %v834_v36 = vadd.f32 %v830_v33, %v822_v30  ;;  %v716_v37 = vpop.f32.mrf.mxu0  ;;  %v807_v38 = vpop.f32.mrf.mxu1 }
 0x21e   : > { %v838_v39 = vsel %vm494_vm4, %v817_v25, %v837_v35  ;;  %v851_v46 = vrot.slane %v807_v38, 2 }
 0x21f   : > { %v860_v41 = vadd.f32 %v834_v36, %v1571_v48  ;;  %v844_v42 = vadd.f32 %v838_v39, %v704_v0  ;;  %v718_v43 = vpop.f32.mrf.mxu0  ;;  %v1147_v44 = vpop.f32.mrf.mxu1 }
 0x220   : > { %v839_v47 = vrot.slane %v718_v43, 1  ;;  %v852_v54 = vsel %vm507_vm5, %v849_v34, %v851_v46 }
 0x221   : > { %862 = vst [vmem:[%s1659_s18 + $0x8] sm:$0xff] %v860_v41  ;;  %v856_v51 = vadd.f32 %v850_v45, %v844_v42 }
 0x222   : > { %v840_v52 = vsel %vm494_vm4, %v837_v35, %v839_v47  ;;  %v846_v50 = vadd.f32 %v839_v47, %v716_v37 }
 0x223   : > { %v869_v53 = vadd.f32 %v863_v40, %v856_v51  ;;  %v845_v48 = vadd.f32 %v840_v52, %v710_v26 }
 0x224   : > { %v858_v55 = vadd.f32 %v851_v46, %v846_v50 }
 0x225   : > { %999 = vst [vmem:[%s1659_s18 + $0xe] sm:$0xfc] %v869_v53  ;;  %v857_v2 = vadd.f32 %v852_v54, %v845_v48 }
 0x226   : > { %v871_v57 = vadd.f32 %v864_v49, %v858_v55 }
 0x227   : > { %v870_v58 = vadd.f32 %v865_v56, %v857_v2 }
 0x228   : > { %1001 = vst [vmem:[%s1659_s18 + $0x1e] sm:$0x3] %v871_v57 }
 0x229   : > { %1000 = vst [vmem:[%s1659_s18 + $0x16] sm:$0xff] %v870_v58 }
 0x22a   : > { %1316 = shalt.err (!%p1313_p9)
}
 0x22b   : > { %s1317_s22 = scalar_lea.hbm %s1678_s29, 512  ;;  %s1321_s26 = scalar_lea.hbm %s1728_s3, 1024 }
 0x22c   : > { %p1318_p13 = scmp.ne.s32.totalorder %s1678_s29, %s1317_s22  ;;  %p1322_p4 = scmp.lt.s32.totalorder %s1678_s29, %s1728_s3 }
 0x22d   : > { %p1323_p8 = scmp.lt.s32.totalorder %s1321_s26, %s1317_s22 }
 0x22e   : > { %p1319_p5 = pnand %p1318_p13, %p1744_p10 }
 0x22f   : > { %p1324_p3 = por %p1323_p8, %p1322_p4 }
 0x230   : > { %p1320_p0 = pneg %p1319_p5 }
 0x232   : > { %p1325_p11 = pnand %p1324_p3, %p1320_p0 }
 0x234   : > { %1328 = shalt.err (!%p1325_p11)
}
 0x235   : > { %s1383_s6 = smov 128   ;;  %s1384_s18 = smov 8  }
 0x236   : > { %1158 = dma.vmem_to_hbm [thread:$0]  (%p1744_p10), %s1680_s25, 512, %s1678_s29, %s877_s16, %s1383_s6, %s1383_s6, %s1384_s18  }
 0x237 PF: > { %s906_s20 = sand.u32 1, %s1359_s12   ;;  %p1745_p1 = scmp.ne.s32.totalorder %s1734_s19, 0 }
 0x238   : > { %p1746_p2 = scmp.ge.s32.totalorder %s1371_s15, 2  ;;  %s907_s27 = scalar_lea.sflag [#allocation4], %s906_s20 }
 0x23a   : > { %p1172_p6 = pnand %p1746_p2, %p1745_p1 }
 0x23c   : > { %p1173_p12 = pneg %p1172_p6 }
 0x23e   : > { %1354 = dma.done.wait (%p1173_p12), %s907_s27, 512  }
 0x23f   : > { %1356 = vsyncadd (%p1173_p12), %s907_s27, 4294966784  ;;  %p17_p7 = scmp.ge.s32.totalorder %s1477_s7, 4   ;;  %s1747_s12 = smov %s1363_s13 }
 0x240   : > { %s1748_s13 = smov %s1367_s14  ;;  %s1749_s14 = smov %s1493_s11 }
 0x241   : > { %s1750_s15 = smov %s1477_s7  ;;  %19 = sbr.rel (!%p17_p7) target bundleno = 6 (0x6), region = 87 }
 0x246   :  { %912 = vsyncpa [#allocation3], 1 }
 0x247   :  { %914 = vsyncpa [#allocation3 + $0x1], 1 }
 0x248   :  { %915 = vsyncpa [#allocation6], 1 }
 0x249   :  { %916 = vsyncpa [#allocation4], 1 }
 0x24a   :  { %918 = vsyncpa [#allocation4 + $0x1], 1 }

</bundles_post_ra>
